<compile_context>
chip_gen: v5e
topology: v5e:2x2
jax: 0.10.0
libtpu: 0.0.40
codegen_flags: <defaults>
</compile_context>

<pallas_src>
import math

import jax
import jax.numpy as jnp
from jax.experimental import pallas as pl
from jax.experimental.pallas import tpu as pltpu


# ---------------------------------------------------------------------------
# Elementwise affine kernel: z = scale_row * x + shift_row, tiled over rows.
# ---------------------------------------------------------------------------
def _affine_apply_kernel(x_ref, scale_ref, shift_ref, z_ref):
    # scale_ref / shift_ref are (1, W) resident rows; sublane-broadcast FMA.
    z_ref[...] = scale_ref[...] * x_ref[...] + shift_ref[...]


# ---------------------------------------------------------------------------
# Sizing helpers.
# ---------------------------------------------------------------------------
def _vmem_capacity_bytes():
    """Per-core VMEM capacity; conservative (v7x-sized) fallback."""
    try:
        cap = int(pltpu.get_tpu_info().vmem_capacity_bytes)
        if cap > 0:
            return cap
    except Exception:
        pass
    return 64 * 1024 * 1024


_MAX_FOLD_WIDTH = 32768  # keep the minimum (8, W) f32 block <= 1 MiB


def _fold_shape(d):
    """Lane-dense fold width and replication factor for feature dim d."""
    if d % 128 == 0:
        return d, 1
    w = (d * 128) // math.gcd(d, 128)          # lcm(d, 128)
    if w > _MAX_FOLD_WIDTH:
        return d, 1                            # fall back: full-extent D block
    return w, w // d


def _choose_row_tile(n_rows, width, tile_bytes):
    """Rows per block: multiple of 8 sublanes, ~tile_bytes of x per block, and
    >= 2 (even) grid steps whenever possible so v7x megacore uses both cores."""
    if n_rows <= 8:
        return n_rows, 1                       # single full-extent block
    bytes_per_row = 4 * width
    budget_rows = max(8, (tile_bytes // bytes_per_row) // 8 * 8)
    n_steps = max(2, -(-n_rows // budget_rows))
    if n_steps % 2:
        n_steps += 1                           # balanced split across 2 cores
    tr = ((-(-n_rows // n_steps)) + 7) // 8 * 8
    if tr >= n_rows:                           # safety: one full block
        return n_rows, 1
    return tr, -(-n_rows // tr)


# ---------------------------------------------------------------------------
# Forward pass.
# ---------------------------------------------------------------------------
def affine_flow_forward(x, params):
    """x: (B, D) float32.  Returns (z (B, D), log_det (B,))."""
    B, D = x.shape
    x = x.astype(jnp.float32)
    sw1, sb1, sw2, sb2, tw1, tb1, tw2, tb2 = params

    # ---- tiny batch-invariant head, plain JAX (ones @ w1 == broadcast w1) ---
    h_s = jnp.tanh(sw1 + sb1)                                  # (1, H)
    log_scale = h_s @ sw2 + sb2                                # (1, D)
    h_t = jnp.tanh(tw1 + tb1)                                  # (1, H)
    shift_row = (h_t @ tw2 + tb2).astype(jnp.float32)          # (1, D)
    scale_row = jnp.exp(log_scale).astype(jnp.float32)         # (1, D)
    log_det_scalar = jnp.sum(log_scale)                        # ()

    # ---- lane-dense fold: width = lcm(D, 128), pad batch if needed ----------
    W, rep = _fold_shape(D)
    if rep > 1:
        b_pad = -(-B // rep) * rep
        x_work = x if b_pad == B else jnp.concatenate(
            [x, jnp.zeros((b_pad - B, D), x.dtype)], axis=0)
        x2 = x_work.reshape(b_pad // rep, W)
        scale2 = jnp.tile(scale_row, (1, rep))
        shift2 = jnp.tile(shift_row, (1, rep))
    else:
        b_pad = B
        x2, scale2, shift2 = x, scale_row, shift_row

    R = x2.shape[0]

    # ---- generation-aware tile / VMEM sizing --------------------------------
    vmem_cap = _vmem_capacity_bytes()
    vmem_limit = min(vmem_cap * 3 // 4, 64 * 1024 * 1024)      # 48 MiB on v7x
    tile_bytes = min(8 * 1024 * 1024,
                     max(512 * 1024, (vmem_limit - 4 * 1024 * 1024) // 4))
    TR, n_steps = _choose_row_tile(R, W, tile_bytes)

    z2 = pl.pallas_call(
        _affine_apply_kernel,
        out_shape=jax.ShapeDtypeStruct((R, W), jnp.float32),
        grid=(n_steps,),
        in_specs=[
            pl.BlockSpec((TR, W), lambda i: (i, 0)),   # x tile (pipelined)
            pl.BlockSpec((1, W), lambda i: (0, 0)),    # scale row (resident)
            pl.BlockSpec((1, W), lambda i: (0, 0)),    # shift row (resident)
        ],
        out_specs=pl.BlockSpec((TR, W), lambda i: (i, 0)),
        compiler_params=pltpu.CompilerParams(
            dimension_semantics=("parallel",),         # megacore on v7x
            vmem_limit_bytes=vmem_limit,
        ),
    )(x2, scale2, shift2)

    if rep > 1:
        z = z2.reshape(b_pad, D)[:B]
    else:
        z = z2

    # log_det is identical for every batch row (constant dummy-ones input).
    log_det = jnp.broadcast_to(log_det_scalar, (B,))
    return z, log_det


# ---------------------------------------------------------------------------
# Parameters + pure-JAX reference.
# ---------------------------------------------------------------------------
def init_params(key, input_dim, hidden_dim):
    """Deterministic parameter init matching the nn.Linear shapes."""
    ks = jax.random.split(key, 8)

    def lin(kw, kb, fan_in, fan_out):
        bound = 1.0 / jnp.sqrt(fan_in)
        w = jax.random.uniform(kw, (fan_in, fan_out), jnp.float32, -bound, bound)
        b = jax.random.uniform(kb, (1, fan_out), jnp.float32, -bound, bound)
        return w, b

    sw1, sb1 = lin(ks[0], ks[1], 1, hidden_dim)
    sw2, sb2 = lin(ks[2], ks[3], hidden_dim, input_dim)
    tw1, tb1 = lin(ks[4], ks[5], 1, hidden_dim)
    tw2, tb2 = lin(ks[6], ks[7], hidden_dim, input_dim)
    return (sw1, sb1, sw2, sb2, tw1, tb1, tw2, tb2)


def reference_forward(x, params):
    """Pure-JAX reference mirroring the PyTorch forward exactly."""
    (sw1, sb1, sw2, sb2, tw1, tb1, tw2, tb2) = params
    B = x.shape[0]
    dummy = jnp.ones((B, 1), jnp.float32)
    log_scale = jnp.tanh(dummy @ sw1 + sb1) @ sw2 + sb2
    shift = jnp.tanh(dummy @ tw1 + tb1) @ tw2 + tb2
    z = jnp.exp(log_scale) * x + shift
    return z, jnp.sum(log_scale, axis=1)


if __name__ == "__main__":
    key = jax.random.PRNGKey(0)
    k_x, k_p = jax.random.split(key)

    fwd = jax.jit(affine_flow_forward)

    def check(batch, input_dim, hidden_dim, kx, kp):
        params = init_params(kp, input_dim, hidden_dim)
        x = jax.random.normal(kx, (batch, input_dim), dtype=jnp.float32)
        z, log_det = fwd(x, params)
        jax.block_until_ready((z, log_det))
        z_ref, ld_ref = reference_forward(x, params)
        assert z.shape == z_ref.shape and log_det.shape == ld_ref.shape
        assert jnp.allclose(z, z_ref, atol=1e-5, rtol=1e-5)
        assert jnp.allclose(log_det, ld_ref, atol=1e-5, rtol=1e-5)

    # Small shape consistent with the module defaults (hidden_dim=16).
    check(4, 16, 16, k_x, k_p)
    # Folded path with batch padding (B not a multiple of 128 // D).
    check(13, 16, 16, k_x, k_p)
    # Generalized fold: D = 48 -> W = lcm(48,128) = 384, rep = 8.
    check(13, 48, 16, k_x, k_p)
    # No-fold path (D multiple of 128) with a multi-step parallel grid.
    check(32, 128, 16, k_x, k_p)
    # Larger batch exercising multi-tile pipelining on the folded path.
    check(1000, 16, 16, k_x, k_p)

    print("KERNEL_OK")
</pallas_src>

<mosaic_0001>
module attributes {stable_mosaic.version = 11 : i64} {
  func.func @_affine_apply_kernel(%arg0: i32, %arg1: memref<1x128xf32, #tpu.memory_space<vmem>>, %arg2: memref<1x128xf32, #tpu.memory_space<vmem>>, %arg3: memref<1x128xf32, #tpu.memory_space<vmem>>, %arg4: memref<1x128xf32, #tpu.memory_space<vmem>>) attributes {dimension_semantics = [#tpu.dimension_semantics<parallel>], iteration_bounds = array<i64: 1>, scalar_prefetch = 0 : i64, scratch_operands = 0 : i64, tpu.core_type = #tpu.core_type<tc>, window_params = [{transform_indices = @transform_0, window_bounds = array<i64: 1, 128>}, {pipeline_mode = #tpu.pipeline_mode<synchronous>, transform_indices = @transform_1, window_bounds = array<i64: 1, 128>}, {pipeline_mode = #tpu.pipeline_mode<synchronous>, transform_indices = @transform_2, window_bounds = array<i64: 1, 128>}, {transform_indices = @transform_3, window_bounds = array<i64: 1, 128>}]} {
    %c0 = arith.constant 0 : index
    %c0_0 = arith.constant 0 : index
    %0 = vector.load %arg2[%c0, %c0_0] : memref<1x128xf32, #tpu.memory_space<vmem>>, vector<1x128xf32>
    %c0_1 = arith.constant 0 : index
    %c0_2 = arith.constant 0 : index
    %1 = vector.load %arg1[%c0_1, %c0_2] : memref<1x128xf32, #tpu.memory_space<vmem>>, vector<1x128xf32>
    %2 = arith.mulf %0, %1 : vector<1x128xf32>
    %c0_3 = arith.constant 0 : index
    %c0_4 = arith.constant 0 : index
    %3 = vector.load %arg3[%c0_3, %c0_4] : memref<1x128xf32, #tpu.memory_space<vmem>>, vector<1x128xf32>
    %4 = arith.addf %2, %3 : vector<1x128xf32>
    %c0_5 = arith.constant 0 : index
    %c0_6 = arith.constant 0 : index
    %5 = vector.load %arg4[%c0_5, %c0_6] : memref<1x128xf32, #tpu.memory_space<vmem>>, vector<1x128xf32>
    tpu.vector_store %arg4[%c0_5, %c0_6], %4 {strides = array<i32>} : memref<1x128xf32, #tpu.memory_space<vmem>>, vector<1x128xf32>,
    return
  }
  func.func @transform_0(%arg0: i32) -> (i32, i32) {
    %c0_i32 = arith.constant 0 : i32
    %c0_i32_0 = arith.constant 0 : i32
    return %arg0, %c0_i32 : i32, i32
  }
  func.func @transform_1(%arg0: i32) -> (i32, i32) {
    %c0_i32 = arith.constant 0 : i32
    %c0_i32_0 = arith.constant 0 : i32
    %c0_i32_1 = arith.constant 0 : i32
    return %c0_i32, %c0_i32_0 : i32, i32
  }
  func.func @transform_2(%arg0: i32) -> (i32, i32) {
    %c0_i32 = arith.constant 0 : i32
    %c0_i32_0 = arith.constant 0 : i32
    %c0_i32_1 = arith.constant 0 : i32
    return %c0_i32, %c0_i32_0 : i32, i32
  }
  func.func @transform_3(%arg0: i32) -> (i32, i32) {
    %c0_i32 = arith.constant 0 : i32
    %c0_i32_0 = arith.constant 0 : i32
    return %arg0, %c0_i32 : i32, i32
  }
}

</mosaic_0001>

<bundles_post_ra>
// kernel: affine_flow_forward.1
= control target key start
LH: loop header
LB: loop body
LE: loop exit
PB: predicated region body
PF: predicated region fallthrough
CT: control target
= control target key end

     0   :  { %s56_s0 = inlined_call_operand.vmem [shape: f32[1,128], index: 0, kind: input, shape index: {}]   ;;  %s57_s1 = inlined_call_operand.vmem [shape: f32[1,128], index: 1, kind: input, shape index: {}]   ;;  %s58_s2 = inlined_call_operand.vmem [shape: f32[1,128], index: 2, kind: input, shape index: {}]   ;;  %s59_s3 = inlined_call_operand.vmem [shape: f32[1,128], index: 3, kind: output, shape index: {}]  }
   0x1   :  { %v14_v0 = vld [vmem:[%s57_s1] sm:$0x1] }
   0x2   :  { %v15_v1 = vld [vmem:[%s56_s0] sm:$0x1] }
   0x3   :  { %v17_v2 = vld [vmem:[%s58_s2] sm:$0x1]  ;;  %v16_v3 = vmul.f32 %v15_v1, %v14_v0 }
   0x5   :  { %v18_v4 = vadd.f32 %v17_v2, %v16_v3 }
   0x7   :  { %19 = vst [vmem:[%s59_s3] sm:$0x1] %v18_v4 }

</bundles_post_ra>
